<compile_context>
chip_gen: v7x
topology: tpu7x:2x2x1
jax: 0.10.0
libtpu: 0.0.40
codegen_flags: <defaults>
</compile_context>

<pallas_src>
import functools

import jax
import jax.numpy as jnp
from jax.experimental import pallas as pl
from jax.experimental.pallas import tpu as pltpu


def _round_up(v, m):
    return (v + m - 1) // m * m


def _pick_tile_k(K, max_tile_k=7168):
    """Largest K tile <= max_tile_k that is a multiple of 128 and divides the
    128-rounded K exactly (avoids streaming padded zero weights).
    For the real K=150528 this returns 7168 (150528 = 21 * 7168)."""
    k128 = _round_up(K, 128)
    if k128 <= max_tile_k:
        return k128
    for cand in range(max_tile_k, 127, -128):
        if k128 % cand == 0:
            return cand
    return 128  # unreachable: 128 always divides k128


def _logistic_kernel(x_ref, w_ref, b_ref, o_ref):
    # x_ref: (k_tiles, B_pad, tile_k) bf16 -- resident in VMEM for the whole
    #        grid (constant block index); indexed per K-step with x_ref[k].
    # w_ref: (tile_k, tile_n) bf16     b_ref: (1, tile_n) f32
    # o_ref: (B_pad, tile_n) f32 -- doubles as the f32 accumulator (its block
    #        index is constant across the k axis, so it stays VMEM-resident).
    k = pl.program_id(1)

    @pl.when(k == 0)
    def _():
        o_ref[...] = jnp.zeros_like(o_ref)

    o_ref[...] += jnp.dot(
        x_ref[k], w_ref[...], preferred_element_type=jnp.float32
    )

    @pl.when(k == pl.num_programs(1) - 1)
    def _():
        o_ref[...] = jax.nn.sigmoid(o_ref[...] + b_ref[...])


def prepare_params(weight, bias, *, tile_n=512, max_tile_k=7168):
    """One-time parameter prep (NOT inside the jitted forward).

    weight: (N, K) PyTorch layout, bias: (N,).
    Returns (w_t, b_p, tile_k):
      w_t: (K_pad, N_pad) bf16, pre-transposed + zero-padded
      b_p: (1, N_pad) f32, zero-padded
      tile_k: chosen K tile (divides K_pad)
    """
    N, K = weight.shape
    tile_k = _pick_tile_k(K, max_tile_k)
    K_pad = _round_up(K, tile_k)
    N_pad = _round_up(N, tile_n)

    w_t = jnp.zeros((K_pad, N_pad), jnp.bfloat16)
    w_t = w_t.at[:K, :N].set(weight.astype(jnp.float32).T.astype(jnp.bfloat16))
    b_p = jnp.zeros((1, N_pad), jnp.float32).at[0, :N].set(bias.astype(jnp.float32))
    return w_t, b_p, tile_k


@functools.partial(jax.jit, static_argnames=("n_valid", "tile_n", "tile_k"))
def starting_network_forward(x_nchw, w_t, b_p, *, n_valid, tile_n, tile_k):
    """x_nchw: (B, C, H, W); w_t: (K_pad, N_pad) bf16; b_p: (1, N_pad) f32."""
    B = x_nchw.shape[0]
    K = x_nchw.shape[1] * x_nchw.shape[2] * x_nchw.shape[3]
    K_pad, N_pad = w_t.shape
    k_tiles = K_pad // tile_k
    n_tiles = N_pad // tile_n
    B_pad = _round_up(B, 16)  # bf16 sublane packing: one vreg holds (16, 128)

    # Glue: flatten (nn.Flatten), cast to bf16 for streaming, pad, and
    # re-layout so the K-tile index is the leading axis -> the kernel keeps
    # the whole activation resident in VMEM and indexes it with x_ref[k].
    x2d = x_nchw.reshape(B, K).astype(jnp.bfloat16)
    x_p = jnp.zeros((B_pad, K_pad), jnp.bfloat16).at[:B, :K].set(x2d)
    x_t = x_p.reshape(B_pad, k_tiles, tile_k).transpose(1, 0, 2)

    out_p = pl.pallas_call(
        _logistic_kernel,
        out_shape=jax.ShapeDtypeStruct((B_pad, N_pad), jnp.float32),
        grid_spec=pltpu.PrefetchScalarGridSpec(
            num_scalar_prefetch=0,
            grid=(n_tiles, k_tiles),  # (parallel N tiles, K reduction)
            in_specs=[
                # x: full array, constant block index -> fetched once, resident.
                pl.BlockSpec((k_tiles, B_pad, tile_k), lambda j, k: (0, 0, 0)),
                # W^T tile: the only large streamed operand.
                pl.BlockSpec((tile_k, tile_n), lambda j, k: (k, j)),
                # bias: fetched once per N tile.
                pl.BlockSpec((1, tile_n), lambda j, k: (0, j)),
            ],
            # Output block index constant across k -> acts as the accumulator.
            out_specs=pl.BlockSpec((B_pad, tile_n), lambda j, k: (0, j)),
        ),
        compiler_params=pltpu.CompilerParams(
            dimension_semantics=("parallel", "arbitrary"),
            vmem_limit_bytes=48 * 1024 * 1024,
        ),
    )(x_t, w_t, b_p)

    return out_p[:B, :n_valid]


def init_params(key, in_features, out_features):
    # Deterministic init mimicking nn.Linear default: U(-1/sqrt(K), 1/sqrt(K)).
    kw, kb = jax.random.split(key)
    bound = 1.0 / jnp.sqrt(float(in_features))
    weight = jax.random.uniform(
        kw, (out_features, in_features), jnp.float32, -bound, bound
    )
    bias = jax.random.uniform(kb, (out_features,), jnp.float32, -bound, bound)
    return weight, bias


if __name__ == "__main__":
    # Small shapes consistent with the forward pass (flatten -> fc -> sigmoid).
    B, C, H, W = 2, 3, 16, 16
    OUT = 5005
    K = C * H * W
    TILE_N = 512  # N_pad stays 5120; 10 tiles balance v7x's 2 TensorCores 5/5.

    key = jax.random.PRNGKey(0)
    kx, kp = jax.random.split(key)
    x = jax.random.normal(kx, (B, C, H, W), jnp.float32)
    weight, bias = init_params(kp, K, OUT)

    # One-time param prep (pre-transposed, padded, bf16) -- outside the forward.
    w_t, b_p, tile_k = prepare_params(weight, bias, tile_n=TILE_N)

    y = starting_network_forward(
        x, w_t, b_p, n_valid=OUT, tile_n=TILE_N, tile_k=tile_k
    )
    y = jax.block_until_ready(y)
    assert y.shape == (B, OUT)

    # Reference matching the kernel's streaming precision (bf16 inputs, f32 acc).
    x2d = x.reshape(B, K).astype(jnp.float32)
    xq = x2d.astype(jnp.bfloat16).astype(jnp.float32)
    wq = weight.astype(jnp.bfloat16).astype(jnp.float32)
    ref_bf16 = jax.nn.sigmoid(xq @ wq.T + bias)
    assert jnp.allclose(y, ref_bf16, atol=2e-3, rtol=2e-3)

    # Full-precision reference of the original module (looser tol for bf16 stream).
    ref_f32 = jax.nn.sigmoid(x2d @ weight.T + bias)
    assert jnp.allclose(y, ref_f32, atol=3e-2, rtol=3e-2)

    print("KERNEL_OK")
</pallas_src>

<mosaic_0001>
module attributes {stable_mosaic.version = 11 : i64} {
  func.func @_logistic_kernel(%arg0: i32, %arg1: i32, %arg2: memref<1x16x768xbf16, #tpu.memory_space<vmem>>, %arg3: memref<768x512xbf16, #tpu.memory_space<vmem>>, %arg4: memref<1x512xf32, #tpu.memory_space<vmem>>, %arg5: memref<16x512xf32, #tpu.memory_space<vmem>>) attributes {dimension_semantics = [#tpu.dimension_semantics<parallel>, #tpu.dimension_semantics<arbitrary>], iteration_bounds = array<i64: 10, 1>, scalar_prefetch = 0 : i64, scratch_operands = 0 : i64, tpu.core_type = #tpu.core_type<tc>, window_params = [{pipeline_mode = #tpu.pipeline_mode<synchronous>, transform_indices = @transform_0, window_bounds = array<i64: 1, 16, 768>}, {transform_indices = @transform_1, window_bounds = array<i64: 768, 512>}, {transform_indices = @transform_2, window_bounds = array<i64: 1, 512>}, {transform_indices = @transform_3, window_bounds = array<i64: 16, 512>}]} {
    %c0_i32 = arith.constant 0 : i32
    %0 = arith.cmpi eq, %arg1, %c0_i32 : i32
    %1 = arith.extui %0 : i1 to i32
    %c0_i32_0 = arith.constant 0 : i32
    %2 = arith.cmpi ne, %1, %c0_i32_0 : i32
    scf.if %2 {
      %cst_10 = arith.constant 0.000000e+00 : f32
      %14 = vector.broadcast %cst_10 : f32 to vector<16x512xf32>
      %c0_11 = arith.constant 0 : index
      %c0_12 = arith.constant 0 : index
      %15 = vector.load %arg5[%c0_11, %c0_12] : memref<16x512xf32, #tpu.memory_space<vmem>>, vector<16x512xf32>
      tpu.vector_store %arg5[%c0_11, %c0_12], %14 {strides = array<i32>} : memref<16x512xf32, #tpu.memory_space<vmem>>, vector<16x512xf32>,
    } else {
    }
    %c0 = arith.constant 0 : index
    %c0_1 = arith.constant 0 : index
    %3 = vector.load %arg5[%c0, %c0_1] : memref<16x512xf32, #tpu.memory_space<vmem>>, vector<16x512xf32>
    %4 = arith.index_cast %arg1 : i32 to index
    %c0_2 = arith.constant 0 : index
    %c0_3 = arith.constant 0 : index
    %5 = vector.load %arg2[%4, %c0_2, %c0_3] : memref<1x16x768xbf16, #tpu.memory_space<vmem>>, vector<1x16x768xbf16>
    %6 = vector.shape_cast %5 : vector<1x16x768xbf16> to vector<16x768xbf16>
    %c0_4 = arith.constant 0 : index
    %c0_5 = arith.constant 0 : index
    %7 = vector.load %arg3[%c0_4, %c0_5] : memref<768x512xbf16, #tpu.memory_space<vmem>>, vector<768x512xbf16>
    %cst = arith.constant dense<0.000000e+00> : vector<16x512xf32>
    %8 = tpu.matmul %6, %7, %cst {dimension_numbers = #tpu.dot_dimension_numbers<[1], [0], [0], [1], [0, 0, 1, 1], [], []>} : vector<16x768xbf16>, vector<768x512xbf16>, vector<16x512xf32> -> vector<16x512xf32>
    %9 = arith.addf %3, %8 : vector<16x512xf32>
    %c0_6 = arith.constant 0 : index
    %c0_7 = arith.constant 0 : index
    %10 = vector.load %arg5[%c0_6, %c0_7] : memref<16x512xf32, #tpu.memory_space<vmem>>, vector<16x512xf32>
    tpu.vector_store %arg5[%c0_6, %c0_7], %9 {strides = array<i32>} : memref<16x512xf32, #tpu.memory_space<vmem>>, vector<16x512xf32>,
    %c0_i32_8 = arith.constant 0 : i32
    %11 = arith.cmpi eq, %arg1, %c0_i32_8 : i32
    %12 = arith.extui %11 : i1 to i32
    %c0_i32_9 = arith.constant 0 : i32
    %13 = arith.cmpi ne, %12, %c0_i32_9 : i32
    scf.if %13 {
      %c0_10 = arith.constant 0 : index
      %c0_11 = arith.constant 0 : index
      %14 = vector.load %arg5[%c0_10, %c0_11] : memref<16x512xf32, #tpu.memory_space<vmem>>, vector<16x512xf32>
      %c0_12 = arith.constant 0 : index
      %c0_13 = arith.constant 0 : index
      %15 = vector.load %arg4[%c0_12, %c0_13] : memref<1x512xf32, #tpu.memory_space<vmem>>, vector<1x512xf32>
      %16 = vector.broadcast %15 : vector<1x512xf32> to vector<16x512xf32>
      %17 = arith.addf %14, %16 : vector<16x512xf32>
      %18 = arith.negf %17 : vector<16x512xf32>
      %19 = math.exp %18 : vector<16x512xf32>
      %cst_14 = arith.constant 1.000000e+00 : f32
      %20 = vector.broadcast %cst_14 : f32 to vector<16x512xf32>
      %21 = arith.addf %20, %19 : vector<16x512xf32>
      %22 = arith.divf %20, %21 : vector<16x512xf32>
      %c0_15 = arith.constant 0 : index
      %c0_16 = arith.constant 0 : index
      %23 = vector.load %arg5[%c0_15, %c0_16] : memref<16x512xf32, #tpu.memory_space<vmem>>, vector<16x512xf32>
      tpu.vector_store %arg5[%c0_15, %c0_16], %22 {strides = array<i32>} : memref<16x512xf32, #tpu.memory_space<vmem>>, vector<16x512xf32>,
    } else {
    }
    return
  }
  func.func @transform_0(%arg0: i32, %arg1: i32) -> (i32, i32, i32) {
    %c0_i32 = arith.constant 0 : i32
    %c0_i32_0 = arith.constant 0 : i32
    %c0_i32_1 = arith.constant 0 : i32
    %c0_i32_2 = arith.constant 0 : i32
    return %c0_i32, %c0_i32_0, %c0_i32_1 : i32, i32, i32
  }
  func.func @transform_1(%arg0: i32, %arg1: i32) -> (i32, i32) {
    %c0_i32 = arith.constant 0 : i32
    return %arg1, %arg0 : i32, i32
  }
  func.func @transform_2(%arg0: i32, %arg1: i32) -> (i32, i32) {
    %c0_i32 = arith.constant 0 : i32
    %c0_i32_0 = arith.constant 0 : i32
    return %c0_i32, %arg0 : i32, i32
  }
  func.func @transform_3(%arg0: i32, %arg1: i32) -> (i32, i32) {
    %c0_i32 = arith.constant 0 : i32
    %c0_i32_0 = arith.constant 0 : i32
    return %c0_i32, %arg0 : i32, i32
  }
}

</mosaic_0001>

<bundles_post_ra>
// kernel: starting_network_forward.1
= control target key start
LH: loop header
LB: loop body
LE: loop exit
PB: predicated region body
PF: predicated region fallthrough
CT: control target
= control target key end

     0   :  { %8 = vsyncpa [#allocation3], 0  ;;  %s3154_s0 = inlined_call_operand.vmem [shape: bf16[1,16,768], index: 0, kind: input, shape index: {}]   ;;  %s3155_s1 = inlined_call_operand.hbm [shape: bf16[768,5120], index: 1, kind: input, shape index: {}]   ;;  %s3156_s2 = inlined_call_operand.hbm [shape: f32[1,5120], index: 2, kind: input, shape index: {}]   ;;  %s3157_s3 = inlined_call_operand.vmem [shape: f32[16,5120], index: 3, kind: output, shape index: {}]  }
   0x1   :  { %10 = vsyncpa [#allocation3 + $0x1], 0 }
   0x2   :  { %11 = vsyncpa [#allocation5], 0 }
   0x3   :  { %13 = vsyncpa [#allocation5 + $0x1], 0  ;;  %s2743_s12 = smov 0   ;;  %s2745_s13 = smov 0  }
   0x4   :  { %s2747_s14 = smov 0   ;;  %s2749_s15 = smov 0  }
   0x5   :  { %s2751_s16 = smov 0   ;;  %s2753_s17 = smov 0  }
   0x6 LB: > { %s1965_s18 = sadd.s32 4294967295, %s2716_s17   ;;  %s31_s19 = sadd.s32 1, %s2712_s16  ;;  %s2716_s17 = sphi %s2753_s17, %s19_s17   ;;  %s2712_s16 = sphi %s2751_s16, %s3172_s16   ;;  %s2708_s15 = sphi %s2749_s15, %s3171_s15   ;;  %s2704_s14 = sphi %s2747_s14, %s3170_s14   ;;  %s2700_s13 = sphi %s2745_s13, %s3169_s13   ;;  %s2696_s12 = sphi %s2743_s12, %s3168_s12  }
   0x7   : > { %p33_p0 = scmp.ge.s32.totalorder %s31_s19, 10  ;;  %s61_s20 = sadd.s32 1, %s2704_s14 }
   0x8   : > { %p68_p1 = scmp.ne.s32.totalorder %s2704_s14, %s2700_s13  ;;  %p69_p2 = scmp.eq.s32.totalorder %s2716_s17, 0 }
   0x9   : > { %s3174_s19 = smov (%p33_p0, %s31_s19), 0  ;;  %p74_p4 = scmp.ne.s32.totalorder %s2700_s13, %s2696_s12 }
   0xa   : > { %p2779_p3 = por %p69_p2, %p68_p1  ;;  %s57_s22 = ssub.s32 %s2712_s16, %s3174_s19 }
   0xb   : > { %p75_p5 = scmp.eq.s32.totalorder %s1965_s18, 0  ;;  %p59_p6 = scmp.eq.s32.totalorder %s57_s22, 0 }
   0xc   : > { %p124_p7 = scmp.eq.s32.totalorder %s1965_s18, 9  ;;  %p2220_p10 = scmp.lt.s32.totalorder %s2716_s17, 10 }
   0xd   : > { %p2786_p8 = por %p75_p5, %p74_p4  ;;  %s2799_s26 = sand.u32 1, %s2704_s14  }
   0xe   : > { %s2791_s24 = scalar_select %p59_p6, %s2704_s14, %s61_s20  }
   0xf   : > { %s3160_s23 = scalar_select %p2786_p8, 1, 0 }
  0x10   : > { %p2793_p9 = por %p124_p7, %p68_p1  ;;  %s2188_s27 = sshll.u32 %s2712_s16, 8 }
  0x11   : > { %s2207_s28 = smul.u32 1536, %s2799_s26  ;;  %s2806_s4 = scalar_lea.hbm %s3155_s1, %s2188_s27 }
  0x12   : > { %s3161_s25 = scalar_select %p2793_p9, 1, 0 }
  0x13   : > { %p2810_p11 = pnand %p2220_p10, %p2779_p3  ;;  %s157_s6 = scalar_lea.vmem [#allocation2], %s2207_s28 }
  0x14   : > { %s167_s7 = sshll.u32 %s157_s6, 4  ;;  %s154_s8 = scalar_lea.sflag [#allocation3], %s2799_s26  ;;  %s2814_s7 = int_to_ptr.vmem [resolvable:$true] %s167_s7 }
  0x15   : > { %s2602_s9 = scalar_lea.hbm %s2806_s4, 24576  ;;  %p2604_p0 = pneg %p2810_p11 }
  0x16   : > { %p2603_p13 = scmp.ne.s32.totalorder %s2806_s4, %s2602_s9  ;;  %s2607_s12 = scalar_lea.hbm %s3155_s1, 245760 }
  0x17   : > { %p2608_p3 = scmp.lt.u32.totalorder %s2806_s4, %s3155_s1  ;;  %p2609_p4 = scmp.lt.u32.totalorder %s2607_s12, %s2602_s9 }
  0x18   : > { %p2605_p1 = pnand %p2604_p0, %p2603_p13  ;;  %p2611_p6 = scmp.lt.u32.totalorder %s2602_s9, %s2806_s4 }
  0x19   : > { %p2610_p5 = por %p2609_p4, %p2608_p3 }
  0x1a   : > { %p2606_p2 = pneg %p2605_p1 }
  0x1b   : > { %p2612_p7 = por %p2611_p6, %p2610_p5 }
  0x1d   : > { %p2613_p10 = pnand %p2612_p7, %p2606_p2 }
  0x1f   : > { %2616 = shalt.err (!%p2613_p10)
}
  0x20   : > { %s2617_s21 = scalar_lea.vmem %s2814_s7, 24576  ;;  %s2718_s22 = smov [#allocation2]  }
  0x21   : > { %p2618_p13 = scmp.ne.s32.totalorder %s2814_s7, %s2617_s21  ;;  %s2622_s27 = sshll.u32 %s2718_s22, 4  ;;  %s2623_s27 = int_to_ptr.vmem [resolvable:$false] %s2622_s27 }
  0x22   : > { %s2624_s28 = scalar_lea.vmem %s2623_s27, 49152  ;;  %p2625_p9 = scmp.lt.s32.totalorder %s2814_s7, %s2623_s27 }
  0x23   : > { %p2620_p1 = pnand %p2618_p13, %p2604_p0  ;;  %p2626_p3 = scmp.lt.s32.totalorder %s2624_s28, %s2617_s21 }
  0x25   : > { %p2621_p12 = pneg %p2620_p1  ;;  %p2627_p4 = por %p2626_p3, %p2625_p9 }
  0x27   : > { %p2628_p5 = pnand %p2627_p4, %p2621_p12 }
  0x29   : > { %2631 = shalt.err (!%p2628_p5)
}
  0x2a   : > { %s2719_s29 = smov 2560   ;;  %s2720_s30 = smov 256  }
  0x2b   : > { %s2721_s6 = smov 16   ;;  %p194_p2 = scmp.lt.s32.totalorder %s2716_s17, 11 }
  0x2c   : > { %2216 = dma.hbm_to_vmem [thread:$0]  (!%p2810_p11), %s2806_s4, 24576, %s2814_s7, %s154_s8, %s2719_s29, %s2720_s30, %s2721_s6  }
  0x2d   : > { %s1971_s9 = sshll.u32 %s2799_s26, 2  ;;  %s2189_s10 = sshll.u32 %s2712_s16, 6 }
  0x2e   : > { %p3163_p9 = scmp.ge.s32.totalorder %s2716_s17, 1  ;;  %s2857_s20 = scalar_lea.hbm %s3156_s2, %s2189_s10 }
  0x2f   : > { %s181_s21 = scalar_lea.vmem [#allocation4], %s1971_s9  ;;  %s178_s4 = scalar_lea.sflag [#allocation5], %s2799_s26 }
  0x30   : > { %p2850_p12 = pnand %p3163_p9, %p194_p2  ;;  %s189_s22 = sshll.u32 %s181_s21, 4  ;;  %s190_s22 = int_to_ptr.vmem [resolvable:$true] %s189_s22 }
  0x31   : > { %s2632_s7 = scalar_lea.hbm %s2857_s20, 64  ;;  %s2637_s28 = scalar_lea.hbm %s3156_s2, 640 }
  0x32   : > { %s3164_s11 = scalar_select %p2850_p12, 1, 0 }
  0x33   : > { %p2633_p6 = scmp.ne.s32.totalorder %s2857_s20, %s2632_s7  ;;  %p2638_p13 = scmp.lt.u32.totalorder %s2857_s20, %s3156_s2 }
  0x34   : > { %p2639_p1 = scmp.lt.u32.totalorder %s2637_s28, %s2632_s7  ;;  %p2641_p4 = scmp.lt.u32.totalorder %s2632_s7, %s2857_s20 }
  0x35   : > { %p2635_p7 = pnand %p2633_p6, %p2604_p0 }
  0x36   : > { %p2640_p3 = por %p2639_p1, %p2638_p13 }
  0x37   : > { %p2636_p10 = pneg %p2635_p7 }
  0x38   : > { %p2642_p5 = por %p2641_p4, %p2640_p3 }
  0x3a   : > { %p2643_p2 = pnand %p2642_p5, %p2636_p10 }
  0x3c   : > { %2646 = shalt.err (!%p2643_p2)
}
  0x3d   : > { %s2647_s26 = scalar_lea.vmem %s190_s22, 64  ;;  %s2722_s6 = smov [#allocation4]  }
  0x3e   : > { %p2648_p9 = scmp.ne.s32.totalorder %s190_s22, %s2647_s26  ;;  %s2652_s9 = sshll.u32 %s2722_s6, 4  ;;  %s2653_s9 = int_to_ptr.vmem [resolvable:$false] %s2652_s9 }
  0x3f   : > { %s2654_s10 = scalar_lea.vmem %s2653_s9, 128  ;;  %p2655_p8 = scmp.lt.s32.totalorder %s190_s22, %s2653_s9 }
  0x40   : > { %p2650_p6 = pnand %p2648_p9, %p2604_p0  ;;  %p2656_p12 = scmp.lt.s32.totalorder %s2654_s10, %s2647_s26 }
  0x42   : > { %p2651_p7 = pneg %p2650_p6  ;;  %p2657_p1 = por %p2656_p12, %p2655_p8 }
  0x44   : > { %p2658_p13 = pnand %p2657_p1, %p2651_p7 }
  0x46   : > { %2661 = shalt.err (!%p2658_p13)
}
  0x47   : > { %2219 = dma.hbm_to_vmem [thread:$0]  (!%p2810_p11), %s2857_s20, 64, %s190_s22, %s178_s4  }
  0x48   : > { %p3165_p10 = scmp.ne.s32.totalorder %s3164_s11, 0 }
  0x49   : > { %s2882_s12 = sand.u32 (!%p3165_p10), 1, %s2700_s13   ;;  %p3166_p8 = scmp.ne.s32.totalorder (!%p3165_p10), %s3160_s23, 0 }
  0x4a   : > { %198 = sbr.rel (%p3165_p10) target bundleno = 534 (0x216), region = 32  ;;  %s201_s21 = scalar_lea.sflag (!%p3165_p10), [#allocation3], %s2882_s12 }
  0x4b   : > { %s2208_s18 = smul.u32 (!%p3165_p10), 1536, %s2882_s12 }
  0x4d   : > { %s2886_s7 = scalar_lea.vmem (!%p3165_p10), [#allocation2], %s2208_s18 }
  0x51   : > { %2687 = dma.done.wait (%p3166_p8), %s201_s21, 24576  }
  0x52   : > { %2689 = vsyncadd (%p3166_p8), %s201_s21, 4294942720  ;;  %s1975_s5 = sshll.u32 %s2882_s12, 2  ;;  %s210_s11 = scalar_lea.sflag [#allocation5], %s2882_s12 }
  0x53   : > { %s2894_s20 = scalar_lea.vmem [#allocation4], %s1975_s5 }
  0x54   : > { %2691 = dma.done.wait (%p3166_p8), %s210_s11, 64  }
  0x55   : > { %2693 = vsyncadd (%p3166_p8), %s210_s11, 4294967232  ;;  %v2273_v0 = vld [vmem:[%s2886_s7 + $0x4] ss:$16 sps:$4 sm:$0xff]   ;;  %v2275_v1 = vld [vmem:[%s2886_s7 + $0xc] ss:$16 sps:$4 sm:$0xff]   ;;  %s1976_s18 = sshll.u32 %s2882_s12, 6 }
  0x56   : > { %1455 = vmatprep.subr.bf16.mxu0 %v2273_v0  ;;  %v2277_v2 = vld [vmem:[%s2886_s7] ss:$16 sps:$4 sm:$0xff]   ;;  %v2278_v3 = vld [vmem:[%s2886_s7 + $0x8] ss:$16 sps:$4 sm:$0xff]   ;;  %1584 = vmatprep.subr.bf16.mxu1 %v2275_v1  ;;  %v2279_v4 = vld [vmem:[%s2886_s7 + $0x24] ss:$16 sps:$4 sm:$0xff]  }
  0x57   : > { %1456 = vmatpush1.bf16.msra.mxu0 %v2277_v2  ;;  %1585 = vmatpush1.bf16.msra.mxu1 %v2278_v3  ;;  %v2281_v5 = vld [vmem:[%s2886_s7 + $0x2c] ss:$16 sps:$4 sm:$0xff]   ;;  %v2283_v6 = vld [vmem:[%s2886_s7 + $0x20] ss:$16 sps:$4 sm:$0xff]   ;;  %v2284_v7 = vld [vmem:[%s2886_s7 + $0x28] ss:$16 sps:$4 sm:$0xff]  }
  0x58   : > { %1457 = vmatprep.subr.bf16.mxu0 %v2279_v4  ;;  %1586 = vmatprep.subr.bf16.mxu1 %v2281_v5  ;;  %v2285_v8 = vld [vmem:[%s2886_s7 + $0x44] ss:$16 sps:$4 sm:$0xff]   ;;  %v2287_v9 = vld [vmem:[%s2886_s7 + $0x4c] ss:$16 sps:$4 sm:$0xff]   ;;  %v2289_v10 = vld [vmem:[%s2886_s7 + $0x40] ss:$16 sps:$4 sm:$0xff]  }
  0x59   : > { %v2290_v11 = vld [vmem:[%s2886_s7 + $0x48] ss:$16 sps:$4 sm:$0xff]   ;;  %v2291_v12 = vld [vmem:[%s2886_s7 + $0x64] ss:$16 sps:$4 sm:$0xff]   ;;  %v2293_v13 = vld [vmem:[%s2886_s7 + $0x6c] ss:$16 sps:$4 sm:$0xff]  }
  0x5a   : > { %v2295_v14 = vld [vmem:[%s2886_s7 + $0x60] ss:$16 sps:$4 sm:$0xff]   ;;  %v2296_v15 = vld [vmem:[%s2886_s7 + $0x68] ss:$16 sps:$4 sm:$0xff]   ;;  %v2297_v16 = vld [vmem:[%s2886_s7 + $0x84] ss:$16 sps:$4 sm:$0xff]  }
  0x5b   : > { %1458 = vmatpush1.bf16.msra.mxu0 %v2283_v6  ;;  %1587 = vmatpush1.bf16.msra.mxu1 %v2284_v7  ;;  %v2299_v17 = vld [vmem:[%s2886_s7 + $0x8c] ss:$16 sps:$4 sm:$0xff]   ;;  %v2301_v18 = vld [vmem:[%s2886_s7 + $0x80] ss:$16 sps:$4 sm:$0xff]   ;;  %v2302_v19 = vld [vmem:[%s2886_s7 + $0x88] ss:$16 sps:$4 sm:$0xff]  }
  0x5c   : > { %1459 = vmatprep.subr.bf16.mxu0 %v2285_v8  ;;  %1588 = vmatprep.subr.bf16.mxu1 %v2287_v9  ;;  %v2303_v20 = vld [vmem:[%s2886_s7 + $0xa4] ss:$16 sps:$4 sm:$0xff]   ;;  %v2305_v21 = vld [vmem:[%s2886_s7 + $0xac] ss:$16 sps:$4 sm:$0xff]   ;;  %v2307_v22 = vld [vmem:[%s2886_s7 + $0xa0] ss:$16 sps:$4 sm:$0xff]  }
  0x5d   : > { %v2308_v23 = vld [vmem:[%s2886_s7 + $0xa8] ss:$16 sps:$4 sm:$0xff]   ;;  %v2309_v24 = vld [vmem:[%s2886_s7 + $0xc4] ss:$16 sps:$4 sm:$0xff]   ;;  %v2311_v25 = vld [vmem:[%s2886_s7 + $0xcc] ss:$16 sps:$4 sm:$0xff]  }
  0x5e   : > { %v2313_v26 = vld [vmem:[%s2886_s7 + $0xc0] ss:$16 sps:$4 sm:$0xff]   ;;  %v2314_v27 = vld [vmem:[%s2886_s7 + $0xc8] ss:$16 sps:$4 sm:$0xff]   ;;  %v2315_v28 = vld [vmem:[%s2886_s7 + $0xe4] ss:$16 sps:$4 sm:$0xff]  }
  0x5f   : > { %1460 = vmatpush1.bf16.msra.mxu0 %v2289_v10  ;;  %1589 = vmatpush1.bf16.msra.mxu1 %v2290_v11  ;;  %v2317_v29 = vld [vmem:[%s2886_s7 + $0xec] ss:$16 sps:$4 sm:$0xff]   ;;  %v2319_v30 = vld [vmem:[%s2886_s7 + $0xe0] ss:$16 sps:$4 sm:$0xff]   ;;  %v2320_v31 = vld [vmem:[%s2886_s7 + $0xe8] ss:$16 sps:$4 sm:$0xff]  }
  0x60   : > { %1461 = vmatprep.subr.bf16.mxu0 %v2291_v12  ;;  %1590 = vmatprep.subr.bf16.mxu1 %v2293_v13  ;;  %v2321_v32 = vld [vmem:[%s2886_s7 + $0x104] ss:$16 sps:$4 sm:$0xff]   ;;  %v2323_v33 = vld [vmem:[%s2886_s7 + $0x10c] ss:$16 sps:$4 sm:$0xff]   ;;  %v2325_v34 = vld [vmem:[%s2886_s7 + $0x100] ss:$16 sps:$4 sm:$0xff]  }
  0x61   : > { %v2326_v35 = vld [vmem:[%s2886_s7 + $0x108] ss:$16 sps:$4 sm:$0xff]   ;;  %v2327_v36 = vld [vmem:[%s2886_s7 + $0x124] ss:$16 sps:$4 sm:$0xff]   ;;  %v2329_v37 = vld [vmem:[%s2886_s7 + $0x12c] ss:$16 sps:$4 sm:$0xff]  }
  0x62   : > { %v2331_v38 = vld [vmem:[%s2886_s7 + $0x120] ss:$16 sps:$4 sm:$0xff]   ;;  %v2332_v39 = vld [vmem:[%s2886_s7 + $0x128] ss:$16 sps:$4 sm:$0xff]   ;;  %v2333_v40 = vld [vmem:[%s2886_s7 + $0x144] ss:$16 sps:$4 sm:$0xff]  }
  0x63   : > { %1462 = vmatpush1.bf16.msra.mxu0 %v2295_v14  ;;  %1591 = vmatpush1.bf16.msra.mxu1 %v2296_v15  ;;  %v2335_v41 = vld [vmem:[%s2886_s7 + $0x14c] ss:$16 sps:$4 sm:$0xff]   ;;  %v2337_v42 = vld [vmem:[%s2886_s7 + $0x140] ss:$16 sps:$4 sm:$0xff]   ;;  %v2338_v43 = vld [vmem:[%s2886_s7 + $0x148] ss:$16 sps:$4 sm:$0xff]  }
  0x64   : > { %1463 = vmatprep.subr.bf16.mxu0 %v2297_v16  ;;  %1592 = vmatprep.subr.bf16.mxu1 %v2299_v17  ;;  %v2339_v44 = vld [vmem:[%s2886_s7 + $0x164] ss:$16 sps:$4 sm:$0xff]   ;;  %v2341_v45 = vld [vmem:[%s2886_s7 + $0x16c] ss:$16 sps:$4 sm:$0xff]   ;;  %v2343_v46 = vld [vmem:[%s2886_s7 + $0x160] ss:$16 sps:$4 sm:$0xff]  }
  0x65   : > { %v2344_v47 = vld [vmem:[%s2886_s7 + $0x168] ss:$16 sps:$4 sm:$0xff]   ;;  %v2371_v48 = vld [vmem:[%s3154_s0 + $0x4] ss:$24 sps:$4 sm:$0xff]   ;;  %v2349_v51 = vld [vmem:[%s2886_s7 + $0x180] ss:$16 sps:$4 sm:$0xff]  }
  0x66   : > { %v2345_v49 = vld [vmem:[%s2886_s7 + $0x184] ss:$16 sps:$4 sm:$0xff]   ;;  %v2347_v50 = vld [vmem:[%s2886_s7 + $0x18c] ss:$16 sps:$4 sm:$0xff]   ;;  %1487 = vmatprep.mubr.bf16.mxu0 %v2371_v48  ;;  %1616 = vmatprep.mubr.bf16.mxu1 %v2371_v48  ;;  %v2350_v52 = vld [vmem:[%s2886_s7 + $0x188] ss:$16 sps:$4 sm:$0xff]  }
  0x67   : > { %1464 = vmatpush1.bf16.msra.mxu0 %v2301_v18  ;;  %1593 = vmatpush1.bf16.msra.mxu1 %v2302_v19  ;;  %v2351_v53 = vld [vmem:[%s2886_s7 + $0x1a4] ss:$16 sps:$4 sm:$0xff]   ;;  %v2353_v54 = vld [vmem:[%s2886_s7 + $0x1ac] ss:$16 sps:$4 sm:$0xff]   ;;  %v2355_v55 = vld [vmem:[%s2886_s7 + $0x1a0] ss:$16 sps:$4 sm:$0xff]  }
  0x68   : > { %1465 = vmatprep.subr.bf16.mxu0 %v2303_v20  ;;  %1594 = vmatprep.subr.bf16.mxu1 %v2305_v21  ;;  %v2356_v56 = vld [vmem:[%s2886_s7 + $0x1a8] ss:$16 sps:$4 sm:$0xff]   ;;  %v2357_v57 = vld [vmem:[%s2886_s7 + $0x1c4] ss:$16 sps:$4 sm:$0xff]   ;;  %v2359_v58 = vld [vmem:[%s2886_s7 + $0x1cc] ss:$16 sps:$4 sm:$0xff]  }
  0x69   : > { %v2361_v59 = vld [vmem:[%s2886_s7 + $0x1c0] ss:$16 sps:$4 sm:$0xff]   ;;  %v2362_v60 = vld [vmem:[%s2886_s7 + $0x1c8] ss:$16 sps:$4 sm:$0xff]   ;;  %v2363_v61 = vld [vmem:[%s2886_s7 + $0x1e4] ss:$16 sps:$4 sm:$0xff]  }
  0x6a   : > { %v2365_v62 = vld [vmem:[%s2886_s7 + $0x1ec] ss:$16 sps:$4 sm:$0xff]   ;;  %v2367_v63 = vld [vmem:[%s2886_s7 + $0x1e0] ss:$16 sps:$4 sm:$0xff]   ;;  %v2368_v0 = vld [vmem:[%s2886_s7 + $0x1e8] ss:$16 sps:$4 sm:$0xff]  }
  0x6b   : > { %1466 = vmatpush1.bf16.msra.mxu0 %v2307_v22  ;;  %1595 = vmatpush1.bf16.msra.mxu1 %v2308_v23  ;;  %v2374_v1 = vld [vmem:[%s2886_s7 + $0x204] ss:$16 sps:$4 sm:$0xff]   ;;  %v2377_v2 = vld [vmem:[%s2886_s7 + $0x20c] ss:$16 sps:$4 sm:$0xff]   ;;  %v2369_v3 = vld [vmem:[%s3154_s0] ss:$24 sps:$4 sm:$0xff]  }
  0x6c   : > { %1467 = vmatprep.subr.bf16.mxu0 %v2309_v24  ;;  %1596 = vmatprep.subr.bf16.mxu1 %v2311_v25  ;;  %v2372_v4 = vld [vmem:[%s2886_s7 + $0x200] ss:$16 sps:$4 sm:$0xff]   ;;  %v2375_v5 = vld [vmem:[%s2886_s7 + $0x208] ss:$16 sps:$4 sm:$0xff]   ;;  %v2380_v6 = vld [vmem:[%s2886_s7 + $0x224] ss:$16 sps:$4 sm:$0xff]  }
  0x6d   : > { %v2383_v7 = vld [vmem:[%s2886_s7 + $0x22c] ss:$16 sps:$4 sm:$0xff]   ;;  %v2378_v8 = vld [vmem:[%s2886_s7 + $0x220] ss:$16 sps:$4 sm:$0xff]   ;;  %v2381_v9 = vld [vmem:[%s2886_s7 + $0x228] ss:$16 sps:$4 sm:$0xff]  }
  0x6e   : > { %v2386_v10 = vld [vmem:[%s2886_s7 + $0x244] ss:$16 sps:$4 sm:$0xff]   ;;  %v2389_v11 = vld [vmem:[%s2886_s7 + $0x24c] ss:$16 sps:$4 sm:$0xff]   ;;  %v2384_v12 = vld [vmem:[%s2886_s7 + $0x240] ss:$16 sps:$4 sm:$0xff]  }
  0x6f   : > { %1468 = vmatpush1.bf16.msra.mxu0 %v2313_v26  ;;  %1597 = vmatpush1.bf16.msra.mxu1 %v2314_v27  ;;  %v2387_v13 = vld [vmem:[%s2886_s7 + $0x248] ss:$16 sps:$4 sm:$0xff]   ;;  %v2392_v14 = vld [vmem:[%s2886_s7 + $0x264] ss:$16 sps:$4 sm:$0xff]   ;;  %v2395_v15 = vld [vmem:[%s2886_s7 + $0x26c] ss:$16 sps:$4 sm:$0xff]  }
  0x70   : > { %1469 = vmatprep.subr.bf16.mxu0 %v2315_v28  ;;  %1598 = vmatprep.subr.bf16.mxu1 %v2317_v29  ;;  %v2390_v16 = vld [vmem:[%s2886_s7 + $0x260] ss:$16 sps:$4 sm:$0xff]   ;;  %v2393_v17 = vld [vmem:[%s2886_s7 + $0x268] ss:$16 sps:$4 sm:$0xff]   ;;  %v2398_v18 = vld [vmem:[%s2886_s7 + $0x284] ss:$16 sps:$4 sm:$0xff]  }
  0x71   : > { %v2401_v19 = vld [vmem:[%s2886_s7 + $0x28c] ss:$16 sps:$4 sm:$0xff]   ;;  %v2396_v20 = vld [vmem:[%s2886_s7 + $0x280] ss:$16 sps:$4 sm:$0xff]   ;;  %v2399_v21 = vld [vmem:[%s2886_s7 + $0x288] ss:$16 sps:$4 sm:$0xff]  }
  0x72   : > { %v2404_v22 = vld [vmem:[%s2886_s7 + $0x2a4] ss:$16 sps:$4 sm:$0xff]   ;;  %v2407_v23 = vld [vmem:[%s2886_s7 + $0x2ac] ss:$16 sps:$4 sm:$0xff]   ;;  %v2402_v24 = vld [vmem:[%s2886_s7 + $0x2a0] ss:$16 sps:$4 sm:$0xff]  }
  0x73   : > { %1470 = vmatpush1.bf16.msra.mxu0 %v2319_v30  ;;  %1599 = vmatpush1.bf16.msra.mxu1 %v2320_v31  ;;  %v2405_v25 = vld [vmem:[%s2886_s7 + $0x2a8] ss:$16 sps:$4 sm:$0xff]   ;;  %v2410_v26 = vld [vmem:[%s2886_s7 + $0x2c4] ss:$16 sps:$4 sm:$0xff]   ;;  %v2413_v27 = vld [vmem:[%s2886_s7 + $0x2cc] ss:$16 sps:$4 sm:$0xff]  }
  0x74   : > { %1471 = vmatprep.subr.bf16.mxu0 %v2321_v32  ;;  %1600 = vmatprep.subr.bf16.mxu1 %v2323_v33  ;;  %v2408_v28 = vld [vmem:[%s2886_s7 + $0x2c0] ss:$16 sps:$4 sm:$0xff]   ;;  %v2411_v29 = vld [vmem:[%s2886_s7 + $0x2c8] ss:$16 sps:$4 sm:$0xff]   ;;  %v2470_v30 = vld [vmem:[%s3154_s0 + $0xc] ss:$24 sps:$4 sm:$0xff]  }
  0x75   : > { %v2416_v31 = vld [vmem:[%s2886_s7 + $0x2e4] ss:$16 sps:$4 sm:$0xff]   ;;  %v2419_v32 = vld [vmem:[%s2886_s7 + $0x2ec] ss:$16 sps:$4 sm:$0xff]   ;;  %v2414_v33 = vld [vmem:[%s2886_s7 + $0x2e0] ss:$16 sps:$4 sm:$0xff]  }
  0x76   : > { %v2443_v48 = vld [vmem:[%s2886_s7 + $0x36c] ss:$16 sps:$4 sm:$0xff]   ;;  %s3112_s21 = scalar_lea.vmem [#allocation6], %s1976_s18  ;;  %p3167_p11 = scmp.ne.s32.totalorder %s3161_s25, 0 }
  0x77   : > { %1472 = vmatpush1.bf16.msra.mxu0 %v2325_v34  ;;  %1601 = vmatpush1.bf16.msra.mxu1 %v2326_v35  ;;  %v2417_v34 = vld [vmem:[%s2886_s7 + $0x2e8] ss:$16 sps:$4 sm:$0xff]   ;;  %v2422_v35 = vld [vmem:[%s2886_s7 + $0x304] ss:$16 sps:$4 sm:$0xff]   ;;  %s2190_s12 = sshll.u32 (%p3167_p11), %s2708_s15, 5 }
  0x78   : > { %1473 = vmatprep.subr.bf16.mxu0 %v2327_v36  ;;  %1602 = vmatprep.subr.bf16.mxu1 %v2329_v37  ;;  %v2425_v36 = vld [vmem:[%s2886_s7 + $0x30c] ss:$16 sps:$4 sm:$0xff]   ;;  %v2420_v37 = vld [vmem:[%s2886_s7 + $0x300] ss:$16 sps:$4 sm:$0xff]   ;;  %s1835_s11 = scalar_lea.vmem (%p3167_p11), %s3157_s3, %s2190_s12 }
  0x7b   : > { %1474 = vmatpush1.bf16.msra.mxu0 %v2331_v38  ;;  %1603 = vmatpush1.bf16.msra.mxu1 %v2332_v39  ;;  %v2423_v38 = vld [vmem:[%s2886_s7 + $0x308] ss:$16 sps:$4 sm:$0xff]   ;;  %v2428_v39 = vld [vmem:[%s2886_s7 + $0x324] ss:$16 sps:$4 sm:$0xff]  }
  0x7c   : > { %1475 = vmatprep.subr.bf16.mxu0 %v2333_v40  ;;  %1604 = vmatprep.subr.bf16.mxu1 %v2335_v41  ;;  %v2431_v40 = vld [vmem:[%s2886_s7 + $0x32c] ss:$16 sps:$4 sm:$0xff]   ;;  %v2426_v41 = vld [vmem:[%s2886_s7 + $0x320] ss:$16 sps:$4 sm:$0xff]  }
  0x7f   : > { %1476 = vmatpush1.bf16.msra.mxu0 %v2337_v42  ;;  %1605 = vmatpush1.bf16.msra.mxu1 %v2338_v43  ;;  %v2429_v42 = vld [vmem:[%s2886_s7 + $0x328] ss:$16 sps:$4 sm:$0xff]   ;;  %v2434_v43 = vld [vmem:[%s2886_s7 + $0x344] ss:$16 sps:$4 sm:$0xff]  }
  0x80   : > { %1477 = vmatprep.subr.bf16.mxu0 %v2339_v44  ;;  %1606 = vmatprep.subr.bf16.mxu1 %v2341_v45  ;;  %v2437_v44 = vld [vmem:[%s2886_s7 + $0x34c] ss:$16 sps:$4 sm:$0xff]   ;;  %v2432_v45 = vld [vmem:[%s2886_s7 + $0x340] ss:$16 sps:$4 sm:$0xff]  }
  0x83   : > { %1478 = vmatpush1.bf16.msra.mxu0 %v2343_v46  ;;  %1607 = vmatpush1.bf16.msra.mxu1 %v2344_v47  ;;  %v2435_v46 = vld [vmem:[%s2886_s7 + $0x348] ss:$16 sps:$4 sm:$0xff]   ;;  %v2440_v47 = vld [vmem:[%s2886_s7 + $0x364] ss:$16 sps:$4 sm:$0xff]  }
  0x84   : > { %1479 = vmatprep.subr.bf16.mxu0 %v2345_v49  ;;  %1608 = vmatprep.subr.bf16.mxu1 %v2347_v50  ;;  %v2438_v49 = vld [vmem:[%s2886_s7 + $0x360] ss:$16 sps:$4 sm:$0xff]   ;;  %v2441_v50 = vld [vmem:[%s2886_s7 + $0x368] ss:$16 sps:$4 sm:$0xff]  }
  0x87   : > { %1480 = vmatpush1.bf16.msra.mxu0 %v2349_v51  ;;  %1609 = vmatpush1.bf16.msra.mxu1 %v2350_v52  ;;  %v2446_v51 = vld [vmem:[%s2886_s7 + $0x384] ss:$16 sps:$4 sm:$0xff]   ;;  %v2449_v52 = vld [vmem:[%s2886_s7 + $0x38c] ss:$16 sps:$4 sm:$0xff]  }
  0x88   : > { %1481 = vmatprep.subr.bf16.mxu0 %v2351_v53  ;;  %1610 = vmatprep.subr.bf16.mxu1 %v2353_v54  ;;  %v2444_v53 = vld [vmem:[%s2886_s7 + $0x380] ss:$16 sps:$4 sm:$0xff]   ;;  %v2447_v54 = vld [vmem:[%s2886_s7 + $0x388] ss:$16 sps:$4 sm:$0xff]  }
  0x8b   : > { %1482 = vmatpush1.bf16.msra.mxu0 %v2355_v55  ;;  %1611 = vmatpush1.bf16.msra.mxu1 %v2356_v56  ;;  %v2452_v55 = vld [vmem:[%s2886_s7 + $0x3a4] ss:$16 sps:$4 sm:$0xff]   ;;  %v2455_v56 = vld [vmem:[%s2886_s7 + $0x3ac] ss:$16 sps:$4 sm:$0xff]  }
  0x8c   : > { %1483 = vmatprep.subr.bf16.mxu0 %v2357_v57  ;;  %1612 = vmatprep.subr.bf16.mxu1 %v2359_v58  ;;  %v2450_v57 = vld [vmem:[%s2886_s7 + $0x3a0] ss:$16 sps:$4 sm:$0xff]   ;;  %v2453_v58 = vld [vmem:[%s2886_s7 + $0x3a8] ss:$16 sps:$4 sm:$0xff]  }
  0x8f   : > { %1484 = vmatpush1.bf16.msra.mxu0 %v2361_v59  ;;  %1613 = vmatpush1.bf16.msra.mxu1 %v2362_v60  ;;  %v2458_v59 = vld [vmem:[%s2886_s7 + $0x3c4] ss:$16 sps:$4 sm:$0xff]   ;;  %v2461_v60 = vld [vmem:[%s2886_s7 + $0x3cc] ss:$16 sps:$4 sm:$0xff]  }
  0x90   : > { %1485 = vmatprep.subr.bf16.mxu0 %v2363_v61  ;;  %1614 = vmatprep.subr.bf16.mxu1 %v2365_v62  ;;  %v2456_v61 = vld [vmem:[%s2886_s7 + $0x3c0] ss:$16 sps:$4 sm:$0xff]   ;;  %v2459_v62 = vld [vmem:[%s2886_s7 + $0x3c8] ss:$16 sps:$4 sm:$0xff]  }
  0x93   : > { %1486 = vmatpush1.bf16.msra.mxu0 %v2367_v63  ;;  %1615 = vmatpush1.bf16.msra.mxu1 %v2368_v0  ;;  %v2464_v63 = vld [vmem:[%s2886_s7 + $0x3e4] ss:$16 sps:$4 sm:$0xff]   ;;  %v2467_v0 = vld [vmem:[%s2886_s7 + $0x3ec] ss:$16 sps:$4 sm:$0xff]  }
  0x94   : > { %1498 = vmatprep.subr.bf16.mxu0 %v2374_v1  ;;  %1627 = vmatprep.subr.bf16.mxu1 %v2377_v2  ;;  %v2462_v1 = vld [vmem:[%s2886_s7 + $0x3e0] ss:$16 sps:$4 sm:$0xff]   ;;  %v2465_v2 = vld [vmem:[%s2886_s7 + $0x3e8] ss:$16 sps:$4 sm:$0xff]  }
  0x96   : > { %1488 = vmatmul.mubr.bf16.vlgmr.msra.gmra.mrb[0].mxu0 %v2369_v3  ;;  %1617 = vmatmul.mubr.bf16.vlgmr.msra.gmra.mrb[0].mxu1 %v2369_v3  ;;  %v2473_v3 = vld [vmem:[%s2886_s7 + $0x404] ss:$16 sps:$4 sm:$0xff]  }
  0x97   : > { %1499 = vmatpush1.bf16.msra.mxu0 %v2372_v4  ;;  %1628 = vmatpush1.bf16.msra.mxu1 %v2375_v5  ;;  %v2476_v4 = vld [vmem:[%s2886_s7 + $0x40c] ss:$16 sps:$4 sm:$0xff]   ;;  %v2468_v5 = vld [vmem:[%s3154_s0 + $0x8] ss:$24 sps:$4 sm:$0xff]  }
  0x98   : > { %1500 = vmatprep.subr.bf16.mxu0 %v2380_v6  ;;  %1629 = vmatprep.subr.bf16.mxu1 %v2383_v7  ;;  %v2471_v6 = vld [vmem:[%s2886_s7 + $0x400] ss:$16 sps:$4 sm:$0xff]   ;;  %v2474_v7 = vld [vmem:[%s2886_s7 + $0x408] ss:$16 sps:$4 sm:$0xff]  }
  0x99   : > { %1530 = vmatprep.mubr.bf16.mxu0 %v2470_v30  ;;  %1659 = vmatprep.mubr.bf16.mxu1 %v2470_v30  ;;  %v2512_v30 = vld [vmem:[%s2886_s7 + $0x4cc] ss:$16 sps:$4 sm:$0xff]  }
  0x9b   : > { %1501 = vmatpush1.bf16.msra.mxu0 %v2378_v8  ;;  %1630 = vmatpush1.bf16.msra.mxu1 %v2381_v9  ;;  %v2479_v8 = vld [vmem:[%s2886_s7 + $0x424] ss:$16 sps:$4 sm:$0xff]   ;;  %v2482_v9 = vld [vmem:[%s2886_s7 + $0x42c] ss:$16 sps:$4 sm:$0xff]  }
  0x9c   : > { %1502 = vmatprep.subr.bf16.mxu0 %v2386_v10  ;;  %1631 = vmatprep.subr.bf16.mxu1 %v2389_v11  ;;  %v2569_v10 = vld [vmem:[%s3154_s0 + $0x14] ss:$24 sps:$4 sm:$0xff]   ;;  %v2477_v11 = vld [vmem:[%s2886_s7 + $0x420] ss:$16 sps:$4 sm:$0xff]  }
  0x9f   : > { %1503 = vmatpush1.bf16.msra.mxu0 %v2384_v12  ;;  %1632 = vmatpush1.bf16.msra.mxu1 %v2387_v13  ;;  %v2480_v12 = vld [vmem:[%s2886_s7 + $0x428] ss:$16 sps:$4 sm:$0xff]   ;;  %v2485_v13 = vld [vmem:[%s2886_s7 + $0x444] ss:$16 sps:$4 sm:$0xff]  }
  0xa0   : > { %1504 = vmatprep.subr.bf16.mxu0 %v2392_v14  ;;  %1633 = vmatprep.subr.bf16.mxu1 %v2395_v15  ;;  %v2488_v14 = vld [vmem:[%s2886_s7 + $0x44c] ss:$16 sps:$4 sm:$0xff]   ;;  %v2483_v15 = vld [vmem:[%s2886_s7 + $0x440] ss:$16 sps:$4 sm:$0xff]  }
  0xa3   : > { %1505 = vmatpush1.bf16.msra.mxu0 %v2390_v16  ;;  %1634 = vmatpush1.bf16.msra.mxu1 %v2393_v17  ;;  %v2486_v16 = vld [vmem:[%s2886_s7 + $0x448] ss:$16 sps:$4 sm:$0xff]   ;;  %v2491_v17 = vld [vmem:[%s2886_s7 + $0x464] ss:$16 sps:$4 sm:$0xff]  }
  0xa4   : > { %1506 = vmatprep.subr.bf16.mxu0 %v2398_v18  ;;  %1635 = vmatprep.subr.bf16.mxu1 %v2401_v19  ;;  %v2494_v18 = vld [vmem:[%s2886_s7 + $0x46c] ss:$16 sps:$4 sm:$0xff]   ;;  %v2489_v19 = vld [vmem:[%s2886_s7 + $0x460] ss:$16 sps:$4 sm:$0xff]  }
  0xa7   : > { %1507 = vmatpush1.bf16.msra.mxu0 %v2396_v20  ;;  %1636 = vmatpush1.bf16.msra.mxu1 %v2399_v21  ;;  %v2492_v20 = vld [vmem:[%s2886_s7 + $0x468] ss:$16 sps:$4 sm:$0xff]   ;;  %v2497_v21 = vld [vmem:[%s2886_s7 + $0x484] ss:$16 sps:$4 sm:$0xff]  }
  0xa8   : > { %1508 = vmatprep.subr.bf16.mxu0 %v2404_v22  ;;  %1637 = vmatprep.subr.bf16.mxu1 %v2407_v23  ;;  %v2500_v22 = vld [vmem:[%s2886_s7 + $0x48c] ss:$16 sps:$4 sm:$0xff]   ;;  %v2495_v23 = vld [vmem:[%s2886_s7 + $0x480] ss:$16 sps:$4 sm:$0xff]  }
  0xab   : > { %1509 = vmatpush1.bf16.msra.mxu0 %v2402_v24  ;;  %1638 = vmatpush1.bf16.msra.mxu1 %v2405_v25  ;;  %v2498_v24 = vld [vmem:[%s2886_s7 + $0x488] ss:$16 sps:$4 sm:$0xff]   ;;  %v2503_v25 = vld [vmem:[%s2886_s7 + $0x4a4] ss:$16 sps:$4 sm:$0xff]  }
  0xac   : > { %1510 = vmatprep.subr.bf16.mxu0 %v2410_v26  ;;  %1639 = vmatprep.subr.bf16.mxu1 %v2413_v27  ;;  %v2506_v26 = vld [vmem:[%s2886_s7 + $0x4ac] ss:$16 sps:$4 sm:$0xff]   ;;  %v2501_v27 = vld [vmem:[%s2886_s7 + $0x4a0] ss:$16 sps:$4 sm:$0xff]  }
  0xaf   : > { %1511 = vmatpush1.bf16.msra.mxu0 %v2408_v28  ;;  %1640 = vmatpush1.bf16.msra.mxu1 %v2411_v29  ;;  %v2504_v28 = vld [vmem:[%s2886_s7 + $0x4a8] ss:$16 sps:$4 sm:$0xff]   ;;  %v2509_v29 = vld [vmem:[%s2886_s7 + $0x4c4] ss:$16 sps:$4 sm:$0xff]  }
  0xb0   : > { %1512 = vmatprep.subr.bf16.mxu0 %v2416_v31  ;;  %1641 = vmatprep.subr.bf16.mxu1 %v2419_v32  ;;  %v2507_v31 = vld [vmem:[%s2886_s7 + $0x4c0] ss:$16 sps:$4 sm:$0xff]   ;;  %v2510_v32 = vld [vmem:[%s2886_s7 + $0x4c8] ss:$16 sps:$4 sm:$0xff]  }
  0xb3   : > { %1513 = vmatpush1.bf16.msra.mxu0 %v2414_v33  ;;  %1642 = vmatpush1.bf16.msra.mxu1 %v2417_v34  ;;  %v2515_v33 = vld [vmem:[%s2886_s7 + $0x4e4] ss:$16 sps:$4 sm:$0xff]   ;;  %v2518_v34 = vld [vmem:[%s2886_s7 + $0x4ec] ss:$16 sps:$4 sm:$0xff]  }
  0xb4   : > { %1514 = vmatprep.subr.bf16.mxu0 %v2422_v35  ;;  %1643 = vmatprep.subr.bf16.mxu1 %v2425_v36  ;;  %v2513_v35 = vld [vmem:[%s2886_s7 + $0x4e0] ss:$16 sps:$4 sm:$0xff]   ;;  %v2516_v36 = vld [vmem:[%s2886_s7 + $0x4e8] ss:$16 sps:$4 sm:$0xff]  }
  0xb7   : > { %1515 = vmatpush1.bf16.msra.mxu0 %v2420_v37  ;;  %1644 = vmatpush1.bf16.msra.mxu1 %v2423_v38  ;;  %v2521_v37 = vld [vmem:[%s2886_s7 + $0x504] ss:$16 sps:$4 sm:$0xff]   ;;  %v2524_v38 = vld [vmem:[%s2886_s7 + $0x50c] ss:$16 sps:$4 sm:$0xff]  }
  0xb8   : > { %1516 = vmatprep.subr.bf16.mxu0 %v2428_v39  ;;  %1645 = vmatprep.subr.bf16.mxu1 %v2431_v40  ;;  %v2519_v39 = vld [vmem:[%s2886_s7 + $0x500] ss:$16 sps:$4 sm:$0xff]   ;;  %v2522_v40 = vld [vmem:[%s2886_s7 + $0x508] ss:$16 sps:$4 sm:$0xff]  }
  0xbb   : > { %1517 = vmatpush1.bf16.msra.mxu0 %v2426_v41  ;;  %1646 = vmatpush1.bf16.msra.mxu1 %v2429_v42  ;;  %v2527_v41 = vld [vmem:[%s2886_s7 + $0x524] ss:$16 sps:$4 sm:$0xff]   ;;  %v2530_v42 = vld [vmem:[%s2886_s7 + $0x52c] ss:$16 sps:$4 sm:$0xff]  }
  0xbc   : > { %1518 = vmatprep.subr.bf16.mxu0 %v2434_v43  ;;  %1647 = vmatprep.subr.bf16.mxu1 %v2437_v44  ;;  %v2525_v43 = vld [vmem:[%s2886_s7 + $0x520] ss:$16 sps:$4 sm:$0xff]   ;;  %v2528_v44 = vld [vmem:[%s2886_s7 + $0x528] ss:$16 sps:$4 sm:$0xff]  }
  0xbf   : > { %1519 = vmatpush1.bf16.msra.mxu0 %v2432_v45  ;;  %1648 = vmatpush1.bf16.msra.mxu1 %v2435_v46  ;;  %v2533_v45 = vld [vmem:[%s2886_s7 + $0x544] ss:$16 sps:$4 sm:$0xff]   ;;  %v2536_v46 = vld [vmem:[%s2886_s7 + $0x54c] ss:$16 sps:$4 sm:$0xff]  }
  0xc0   : > { %1520 = vmatprep.subr.bf16.mxu0 %v2440_v47  ;;  %1649 = vmatprep.subr.bf16.mxu1 %v2443_v48  ;;  %v2531_v47 = vld [vmem:[%s2886_s7 + $0x540] ss:$16 sps:$4 sm:$0xff]   ;;  %v2534_v48 = vld [vmem:[%s2886_s7 + $0x548] ss:$16 sps:$4 sm:$0xff]  }
  0xc3   : > { %1521 = vmatpush1.bf16.msra.mxu0 %v2438_v49  ;;  %1650 = vmatpush1.bf16.msra.mxu1 %v2441_v50  ;;  %v2539_v49 = vld [vmem:[%s2886_s7 + $0x564] ss:$16 sps:$4 sm:$0xff]   ;;  %v2542_v50 = vld [vmem:[%s2886_s7 + $0x56c] ss:$16 sps:$4 sm:$0xff]  }
  0xc4   : > { %1522 = vmatprep.subr.bf16.mxu0 %v2446_v51  ;;  %1651 = vmatprep.subr.bf16.mxu1 %v2449_v52  ;;  %v2537_v51 = vld [vmem:[%s2886_s7 + $0x560] ss:$16 sps:$4 sm:$0xff]   ;;  %v2540_v52 = vld [vmem:[%s2886_s7 + $0x568] ss:$16 sps:$4 sm:$0xff]  }
  0xc7   : > { %1523 = vmatpush1.bf16.msra.mxu0 %v2444_v53  ;;  %1652 = vmatpush1.bf16.msra.mxu1 %v2447_v54  ;;  %v2545_v53 = vld [vmem:[%s2886_s7 + $0x584] ss:$16 sps:$4 sm:$0xff]   ;;  %v2548_v54 = vld [vmem:[%s2886_s7 + $0x58c] ss:$16 sps:$4 sm:$0xff]  }
  0xc8   : > { %1524 = vmatprep.subr.bf16.mxu0 %v2452_v55  ;;  %1653 = vmatprep.subr.bf16.mxu1 %v2455_v56  ;;  %v2543_v55 = vld [vmem:[%s2886_s7 + $0x580] ss:$16 sps:$4 sm:$0xff]   ;;  %v2546_v56 = vld [vmem:[%s2886_s7 + $0x588] ss:$16 sps:$4 sm:$0xff]  }
  0xcb   : > { %1525 = vmatpush1.bf16.msra.mxu0 %v2450_v57  ;;  %1654 = vmatpush1.bf16.msra.mxu1 %v2453_v58  ;;  %v2551_v57 = vld [vmem:[%s2886_s7 + $0x5a4] ss:$16 sps:$4 sm:$0xff]   ;;  %v2554_v58 = vld [vmem:[%s2886_s7 + $0x5ac] ss:$16 sps:$4 sm:$0xff]  }
  0xcc   : > { %1526 = vmatprep.subr.bf16.mxu0 %v2458_v59  ;;  %1655 = vmatprep.subr.bf16.mxu1 %v2461_v60  ;;  %v2549_v59 = vld [vmem:[%s2886_s7 + $0x5a0] ss:$16 sps:$4 sm:$0xff]   ;;  %v2552_v60 = vld [vmem:[%s2886_s7 + $0x5a8] ss:$16 sps:$4 sm:$0xff]  }
  0xcf   : > { %1527 = vmatpush1.bf16.msra.mxu0 %v2456_v61  ;;  %1656 = vmatpush1.bf16.msra.mxu1 %v2459_v62  ;;  %v2557_v61 = vld [vmem:[%s2886_s7 + $0x5c4] ss:$16 sps:$4 sm:$0xff]   ;;  %v2560_v62 = vld [vmem:[%s2886_s7 + $0x5cc] ss:$16 sps:$4 sm:$0xff]  }
  0xd0   : > { %1528 = vmatprep.subr.bf16.mxu0 %v2464_v63  ;;  %1657 = vmatprep.subr.bf16.mxu1 %v2467_v0  ;;  %v2555_v63 = vld [vmem:[%s2886_s7 + $0x5c0] ss:$16 sps:$4 sm:$0xff]   ;;  %v2558_v0 = vld [vmem:[%s2886_s7 + $0x5c8] ss:$16 sps:$4 sm:$0xff]  }
  0xd3   : > { %1529 = vmatpush1.bf16.msra.mxu0 %v2462_v1  ;;  %1658 = vmatpush1.bf16.msra.mxu1 %v2465_v2  ;;  %v2563_v1 = vld [vmem:[%s2886_s7 + $0x5e4] ss:$16 sps:$4 sm:$0xff]   ;;  %v2566_v2 = vld [vmem:[%s2886_s7 + $0x5ec] ss:$16 sps:$4 sm:$0xff]  }
  0xd4   : > { %1541 = vmatprep.subr.bf16.mxu0 %v2473_v3  ;;  %1670 = vmatprep.subr.bf16.mxu1 %v2476_v4  ;;  %v2561_v3 = vld [vmem:[%s2886_s7 + $0x5e0] ss:$16 sps:$4 sm:$0xff]   ;;  %v2564_v4 = vld [vmem:[%s2886_s7 + $0x5e8] ss:$16 sps:$4 sm:$0xff]  }
  0xd6   : > { %1531 = vmatmul.mubr.bf16.vlgmr.msra.gmra.mrb[0].mxu0 %v2468_v5  ;;  %1660 = vmatmul.mubr.bf16.vlgmr.msra.gmra.mrb[0].mxu1 %v2468_v5  ;;  %v2567_v5 = vld [vmem:[%s3154_s0 + $0x10] ss:$24 sps:$4 sm:$0xff]  }
  0xd7   : > { %1542 = vmatpush1.bf16.msra.mxu0 %v2471_v6  ;;  %1671 = vmatpush1.bf16.msra.mxu1 %v2474_v7  ;;  %v1742_v6 = vlaneseq }
  0xd8   : > { %1543 = vmatprep.subr.bf16.mxu0 %v2479_v8  ;;  %1672 = vmatprep.subr.bf16.mxu1 %v2482_v9 }
  0xd9   : > { %1573 = vmatprep.mubr.bf16.mxu0 %v2569_v10  ;;  %1702 = vmatprep.mubr.bf16.mxu1 %v2569_v10  ;;  %v1743_v7 = vshrl.u32 %v1742_v6, 7  ;;  %v1740_v10 = vld [vmem:[%s2894_s20] sm:$0xf] }
  0xdb   : > { %1544 = vmatpush1.bf16.msra.mxu0 %v2477_v11  ;;  %1673 = vmatpush1.bf16.msra.mxu1 %v2480_v12  ;;  %v1744_v8 = vsub.s32 0, %v1743_v7  ;;  %v1752_v9 = vsub.s32 2, %v1743_v7  ;;  %v1748_v11 = vsub.s32 1, %v1743_v7  ;;  %v1756_v12 = vsub.s32 3, %v1743_v7 }
  0xdc   : > { %1545 = vmatprep.subr.bf16.mxu0 %v2485_v13  ;;  %1674 = vmatprep.subr.bf16.mxu1 %v2488_v14 }
  0xdd   : > { %v1745_v13 = vrot.slane %v1740_v10, %v1744_v8  ;;  %v1753_v14 = vrot.slane %v1740_v10, %v1752_v9 }
  0xdf   : > { %1546 = vmatpush1.bf16.msra.mxu0 %v2483_v15  ;;  %1675 = vmatpush1.bf16.msra.mxu1 %v2486_v16 }
  0xe0   : > { %1547 = vmatprep.subr.bf16.mxu0 %v2491_v17  ;;  %1676 = vmatprep.subr.bf16.mxu1 %v2494_v18  ;;  %v1749_v17 = vrot.slane %v1740_v10, %v1748_v11  ;;  %v1757_v18 = vrot.slane %v1740_v10, %v1756_v12 }
  0xe3   : > { %1548 = vmatpush1.bf16.msra.mxu0 %v2489_v19  ;;  %1677 = vmatpush1.bf16.msra.mxu1 %v2492_v20 }
  0xe4   : > { %1549 = vmatprep.subr.bf16.mxu0 %v2497_v21  ;;  %1678 = vmatprep.subr.bf16.mxu1 %v2500_v22 }
  0xe7   : > { %1550 = vmatpush1.bf16.msra.mxu0 %v2495_v23  ;;  %1679 = vmatpush1.bf16.msra.mxu1 %v2498_v24 }
  0xe8   : > { %1551 = vmatprep.subr.bf16.mxu0 %v2503_v25  ;;  %1680 = vmatprep.subr.bf16.mxu1 %v2506_v26 }
  0xeb   : > { %1552 = vmatpush1.bf16.msra.mxu0 %v2501_v27  ;;  %1681 = vmatpush1.bf16.msra.mxu1 %v2504_v28 }
  0xec   : > { %1553 = vmatprep.subr.bf16.mxu0 %v2509_v29  ;;  %1682 = vmatprep.subr.bf16.mxu1 %v2512_v30 }
  0xef   : > { %1554 = vmatpush1.bf16.msra.mxu0 %v2507_v31  ;;  %1683 = vmatpush1.bf16.msra.mxu1 %v2510_v32 }
  0xf0   : > { %1555 = vmatprep.subr.bf16.mxu0 %v2515_v33  ;;  %1684 = vmatprep.subr.bf16.mxu1 %v2518_v34 }
  0xf3   : > { %1556 = vmatpush1.bf16.msra.mxu0 %v2513_v35  ;;  %1685 = vmatpush1.bf16.msra.mxu1 %v2516_v36 }
  0xf4   : > { %1557 = vmatprep.subr.bf16.mxu0 %v2521_v37  ;;  %1686 = vmatprep.subr.bf16.mxu1 %v2524_v38 }
  0xf7   : > { %1558 = vmatpush1.bf16.msra.mxu0 %v2519_v39  ;;  %1687 = vmatpush1.bf16.msra.mxu1 %v2522_v40 }
  0xf8   : > { %1559 = vmatprep.subr.bf16.mxu0 %v2527_v41  ;;  %1688 = vmatprep.subr.bf16.mxu1 %v2530_v42 }
  0xfb   : > { %1560 = vmatpush1.bf16.msra.mxu0 %v2525_v43  ;;  %1689 = vmatpush1.bf16.msra.mxu1 %v2528_v44 }
  0xfc   : > { %1561 = vmatprep.subr.bf16.mxu0 %v2533_v45  ;;  %1690 = vmatprep.subr.bf16.mxu1 %v2536_v46 }
  0xff   : > { %1562 = vmatpush1.bf16.msra.mxu0 %v2531_v47  ;;  %1691 = vmatpush1.bf16.msra.mxu1 %v2534_v48 }
 0x100   : > { %1563 = vmatprep.subr.bf16.mxu0 %v2539_v49  ;;  %1692 = vmatprep.subr.bf16.mxu1 %v2542_v50 }
 0x103   : > { %1564 = vmatpush1.bf16.msra.mxu0 %v2537_v51  ;;  %1693 = vmatpush1.bf16.msra.mxu1 %v2540_v52 }
 0x104   : > { %1565 = vmatprep.subr.bf16.mxu0 %v2545_v53  ;;  %1694 = vmatprep.subr.bf16.mxu1 %v2548_v54 }
 0x107   : > { %1566 = vmatpush1.bf16.msra.mxu0 %v2543_v55  ;;  %1695 = vmatpush1.bf16.msra.mxu1 %v2546_v56 }
 0x108   : > { %1567 = vmatprep.subr.bf16.mxu0 %v2551_v57  ;;  %1696 = vmatprep.subr.bf16.mxu1 %v2554_v58 }
 0x10b   : > { %1568 = vmatpush1.bf16.msra.mxu0 %v2549_v59  ;;  %1697 = vmatpush1.bf16.msra.mxu1 %v2552_v60 }
 0x10c   : > { %1569 = vmatprep.subr.bf16.mxu0 %v2557_v61  ;;  %1698 = vmatprep.subr.bf16.mxu1 %v2560_v62 }
 0x10f   : > { %1570 = vmatpush1.bf16.msra.mxu0 %v2555_v63  ;;  %1699 = vmatpush1.bf16.msra.mxu1 %v2558_v0 }
 0x110   : > { %1571 = vmatprep.subr.bf16.mxu0 %v2563_v1  ;;  %1700 = vmatprep.subr.bf16.mxu1 %v2566_v2 }
 0x113   : > { %1572 = vmatpush1.bf16.msra.mxu0 %v2561_v3  ;;  %1701 = vmatpush1.bf16.msra.mxu1 %v2564_v4 }
 0x116   : > { %1574 = vmatmul.mubr.bf16.vlgmr.msra.gmra.mrb[0].mxu0 %v2567_v5  ;;  %1703 = vmatmul.mubr.bf16.vlgmr.msra.gmra.mrb[0].mxu1 %v2567_v5 }
 0x1e9   : > { %v1575_v15 = vpop.f32.mrb[0].mxu0  ;;  %v1704_v16 = vpop.f32.mrb[0].mxu1 }
 0x1ea   : > { %v1577_v19 = vpop.f32.mrb[1].mxu0  ;;  %v1706_v20 = vpop.f32.mrb[1].mxu1  ;;  %v1762_v23 = vadd.f32 %v1745_v13, %v1575_v15  ;;  %v1764_v24 = vadd.f32 %v1753_v14, %v1704_v16 }
 0x1eb   : > { %v1579_v21 = vpop.f32.mrb[2].mxu0  ;;  %v1708_v22 = vpop.f32.mrb[2].mxu1  ;;  %v1763_v27 = vadd.f32 %v1749_v17, %v1577_v19  ;;  %v1765_v28 = vadd.f32 %v1757_v18, %v1706_v20 }
 0x1ec   : > { %v1581_v25 = vpop.f32.mrb[3].mxu0  ;;  %v1710_v26 = vpop.f32.mrb[3].mxu1  ;;  %v2175_v29 = vmul.f32 -1.442695, %v1762_v23  ;;  %v2177_v30 = vmul.f32 -1.442695, %v1764_v24  ;;  %v1766_v31 = vadd.f32 %v1745_v13, %v1579_v21  ;;  %v1768_v32 = vadd.f32 %v1753_v14, %v1708_v22 }
 0x1ed   : > { %v2176_v33 = vmul.f32 -1.442695, %v1763_v27  ;;  %v2178_v34 = vmul.f32 -1.442695, %v1765_v28  ;;  %v1767_v35 = vadd.f32 %v1749_v17, %v1581_v25  ;;  %v1769_v36 = vadd.f32 %v1757_v18, %v1710_v26 }
 0x1ee   : > { %2570 = vpow2.f32 %v2175_v29  ;;  %v2179_v37 = vmul.f32 -1.442695, %v1766_v31  ;;  %v2181_v38 = vmul.f32 -1.442695, %v1768_v32 }
 0x1ef   : > { %2572 = vpow2.f32 %v2177_v30  ;;  %v2180_v39 = vmul.f32 -1.442695, %v1767_v35  ;;  %v2182_v40 = vmul.f32 -1.442695, %v1769_v36 }
 0x1f0   : > { %2574 = vpow2.f32 %v2176_v33 }
 0x1f1   : > { %2576 = vpow2.f32 %v2178_v34 }
 0x1f2   : > { %2578 = vpow2.f32 %v2179_v37 }
 0x1f3   : > { %2580 = vpow2.f32 %v2181_v38 }
 0x1f4   : > { %2582 = vpow2.f32 %v2180_v39 }
 0x1f5   : > { %2584 = vpow2.f32 %v2182_v40 }
 0x1f8   : > { %v2571_v41 = vpop.eup %2570 }
 0x1f9   : > { %v2573_v42 = vpop.eup %2572  ;;  %v1794_v43 = vadd.f32 1.0, %v2571_v41 }
 0x1fa   : > { %v2575_v44 = vpop.eup %2574  ;;  %v1796_v45 = vadd.f32 1.0, %v2573_v42 }
 0x1fb   : > { %v2577_v46 = vpop.eup %2576  ;;  %2586 = vrcp.f32 %v1794_v43  ;;  %v1795_v47 = vadd.f32 1.0, %v2575_v44 }
 0x1fc   : > { %v2579_v48 = vpop.eup %2578  ;;  %2588 = vrcp.f32 %v1796_v45  ;;  %v1797_v49 = vadd.f32 1.0, %v2577_v46 }
 0x1fd   : > { %v2581_v50 = vpop.eup %2580  ;;  %2590 = vrcp.f32 %v1795_v47  ;;  %v1798_v51 = vadd.f32 1.0, %v2579_v48 }
 0x1fe   : > { %v2583_v52 = vpop.eup %2582  ;;  %2592 = vrcp.f32 %v1797_v49  ;;  %v1800_v53 = vadd.f32 1.0, %v2581_v50 }
 0x1ff   : > { %v2585_v54 = vpop.eup %2584  ;;  %2594 = vrcp.f32 %v1798_v51  ;;  %v1799_v55 = vadd.f32 1.0, %v2583_v52 }
 0x200   : > { %2596 = vrcp.f32 %v1800_v53  ;;  %v1801_v56 = vadd.f32 1.0, %v2585_v54 }
 0x201   : > { %2598 = vrcp.f32 %v1799_v55 }
 0x202   : > { %2600 = vrcp.f32 %v1801_v56 }
 0x205   : > { %v2587_v57 = vpop.eup %2586 }
 0x206   : > { %v2589_v58 = vpop.eup %2588  ;;  %1818 = vst [vmem:[%s3112_s21] sm:$0xff] %v2587_v57 }
 0x207   : > { %v2591_v59 = vpop.eup %2590  ;;  %1820 = vst [vmem:[%s3112_s21 + $0x10] sm:$0xff] %v2589_v58  ;;  %1832 = sbr.rel (!%p3167_p11) target bundleno = 534 (0x216), region = 52 }
 0x208   : > { %v2593_v60 = vpop.eup %2592  ;;  %1819 = vst [vmem:[%s3112_s21 + $0x8] sm:$0xff] %v2591_v59 }
 0x209   : > { %v2595_v61 = vpop.eup %2594  ;;  %1821 = vst [vmem:[%s3112_s21 + $0x18] sm:$0xff] %v2593_v60 }
 0x20a   : > { %v2597_v62 = vpop.eup %2596  ;;  %1822 = vst [vmem:[%s3112_s21 + $0x20] sm:$0xff] %v2595_v61 }
 0x20b   : > { %v2599_v63 = vpop.eup %2598  ;;  %1824 = vst [vmem:[%s3112_s21 + $0x30] sm:$0xff] %v2597_v62 }
 0x20c   : > { %v2601_v0 = vpop.eup %2600  ;;  %1823 = vst [vmem:[%s3112_s21 + $0x28] sm:$0xff] %v2599_v63 }
 0x20d   : > { %1825 = vst [vmem:[%s3112_s21 + $0x38] sm:$0xff] %v2601_v0  ;;  %v1848_v1 = vld [vmem:[%s3112_s21] sm:$0xff] (%p3167_p11) }
 0x20e   : > { %v1852_v3 = vld [vmem:[%s3112_s21 + $0x10] sm:$0xff]  ;;  %1849 = vst [vmem:[%s1835_s11] sm:$0xff] %v1848_v1 }
 0x20f   : > { %v1850_v2 = vld [vmem:[%s3112_s21 + $0x8] sm:$0xff]  ;;  %1853 = vst [vmem:[%s1835_s11 + $0x10] sm:$0xff] %v1852_v3 }
 0x210   : > { %v1854_v4 = vld [vmem:[%s3112_s21 + $0x18] sm:$0xff]  ;;  %1851 = vst [vmem:[%s1835_s11 + $0x8] sm:$0xff] %v1850_v2 }
 0x211   : > { %v1856_v5 = vld [vmem:[%s3112_s21 + $0x20] sm:$0xff]  ;;  %1855 = vst [vmem:[%s1835_s11 + $0x18] sm:$0xff] %v1854_v4 }
 0x212   : > { %1857 = vst [vmem:[%s1835_s11 + $0x140] sm:$0xff] %v1856_v5  ;;  %v1860_v7 = vld [vmem:[%s3112_s21 + $0x30] sm:$0xff] }
 0x213   : > { %v1858_v6 = vld [vmem:[%s3112_s21 + $0x28] sm:$0xff]  ;;  %1861 = vst [vmem:[%s1835_s11 + $0x150] sm:$0xff] %v1860_v7 }
 0x214   : > { %1859 = vst [vmem:[%s1835_s11 + $0x148] sm:$0xff] %v1858_v6  ;;  %v1862_v8 = vld [vmem:[%s3112_s21 + $0x38] sm:$0xff] }
 0x215   : > { %1863 = vst [vmem:[%s1835_s11 + $0x158] sm:$0xff] %v1862_v8 }
 0x216 PF: > { %s19_s17 = sadd.s32 1, %s2716_s17   ;;  %s3168_s12 = smov %s2700_s13 }
 0x217   : > { %p16_p0 = scmp.ge.s32.totalorder %s19_s17, 12   ;;  %s3169_s13 = smov %s2704_s14 }
 0x218   : > { %s3170_s14 = smov %s2791_s24  ;;  %s3171_s15 = smov %s2712_s16 }
 0x219   : > { %s3172_s16 = smov %s3174_s19  ;;  %18 = sbr.rel (!%p16_p0) target bundleno = 6 (0x6), region = 117 }
 0x220   :  { %1879 = vsyncpa [#allocation3], 1 }
 0x221   :  { %1881 = vsyncpa [#allocation3 + $0x1], 1 }
 0x222   :  { %1882 = vsyncpa [#allocation5], 1 }
 0x223   :  { %1884 = vsyncpa [#allocation5 + $0x1], 1 }

</bundles_post_ra>
